<compile_context>
chip_gen: v7x
topology: tpu7x:2x2x1
jax: 0.10.0
libtpu: 0.0.40
codegen_flags: <defaults>
</compile_context>

<pallas_src>
import functools
import math

import jax
import jax.numpy as jnp
from jax.experimental import pallas as pl
from jax.experimental.pallas import tpu as pltpu


# ----------------------------- helpers --------------------------------------

def _round_up(x, m):
    return (x + m - 1) // m * m


def _pick_row_tile(rows):
    # 256-row tiles once there is enough work; otherwise one full block rounded
    # up to the 8-sublane granule.
    if rows >= 256:
        return 256
    return _round_up(rows, 8)


def _pick_col_tile(n):
    for t in (512, 256, 128):
        if n >= t and n % t == 0:
            return t
    return n  # full-dim block (allowed regardless of the 128-lane rule)


def _pad_rows(x, rows_p):
    rows = x.shape[0]
    if rows_p == rows:
        return x
    return jnp.pad(x, ((0, rows_p - rows), (0, 0)))


def _gelu(x):
    # tanh-approximate GELU (jnp.tanh -> EUP path on TPU).
    c = math.sqrt(2.0 / math.pi)
    return 0.5 * x * (1.0 + jnp.tanh(c * (x + 0.044715 * (x * x * x))))


# ----------------------------- LayerNorm kernel ------------------------------

def _layernorm_kernel(x_ref, g_ref, b_ref, o_ref, *, eps):
    x = x_ref[...].astype(jnp.float32)                       # (tm, H)
    mean = jnp.mean(x, axis=-1, keepdims=True)
    xc = x - mean
    var = jnp.mean(xc * xc, axis=-1, keepdims=True)
    y = xc * jax.lax.rsqrt(var + eps)
    y = y * g_ref[...].astype(jnp.float32) + b_ref[...].astype(jnp.float32)
    o_ref[...] = y.astype(o_ref.dtype)


def layernorm(x, gamma, beta, *, eps=1e-6):
    rows, h = x.shape
    tm = _pick_row_tile(rows)
    rows_p = _round_up(rows, tm)
    xp = _pad_rows(x, rows_p)
    row_spec = pl.BlockSpec((tm, h), lambda i: (i, 0))
    vec_spec = pl.BlockSpec((1, h), lambda i: (0, 0))
    out = pl.pallas_call(
        functools.partial(_layernorm_kernel, eps=eps),
        out_shape=jax.ShapeDtypeStruct((rows_p, h), x.dtype),
        grid_spec=pltpu.PrefetchScalarGridSpec(
            num_scalar_prefetch=0,
            grid=(rows_p // tm,),
            in_specs=[row_spec, vec_spec, vec_spec],
            out_specs=row_spec,
        ),
        compiler_params=pltpu.CompilerParams(dimension_semantics=("parallel",)),
    )(xp, gamma.reshape(1, h), beta.reshape(1, h))
    return out if rows_p == rows else out[:rows]


# ------------------------ fused residual-add + LayerNorm ---------------------

def _add_layernorm_kernel(a_ref, b_ref, g_ref, beta_ref, sum_ref, ln_ref, *, eps):
    s = a_ref[...].astype(jnp.float32) + b_ref[...].astype(jnp.float32)
    sum_ref[...] = s.astype(sum_ref.dtype)
    mean = jnp.mean(s, axis=-1, keepdims=True)
    xc = s - mean
    var = jnp.mean(xc * xc, axis=-1, keepdims=True)
    y = xc * jax.lax.rsqrt(var + eps)
    y = y * g_ref[...].astype(jnp.float32) + beta_ref[...].astype(jnp.float32)
    ln_ref[...] = y.astype(ln_ref.dtype)


def add_layernorm(a, b, gamma, beta, *, eps=1e-6):
    """Returns (a + b, LayerNorm(a + b))."""
    rows, h = a.shape
    tm = _pick_row_tile(rows)
    rows_p = _round_up(rows, tm)
    ap, bp = _pad_rows(a, rows_p), _pad_rows(b, rows_p)
    row_spec = pl.BlockSpec((tm, h), lambda i: (i, 0))
    vec_spec = pl.BlockSpec((1, h), lambda i: (0, 0))
    s, ln = pl.pallas_call(
        functools.partial(_add_layernorm_kernel, eps=eps),
        out_shape=(jax.ShapeDtypeStruct((rows_p, h), a.dtype),
                   jax.ShapeDtypeStruct((rows_p, h), a.dtype)),
        grid_spec=pltpu.PrefetchScalarGridSpec(
            num_scalar_prefetch=0,
            grid=(rows_p // tm,),
            in_specs=[row_spec, row_spec, vec_spec, vec_spec],
            out_specs=(row_spec, row_spec),
        ),
        compiler_params=pltpu.CompilerParams(dimension_semantics=("parallel",)),
    )(ap, bp, gamma.reshape(1, h), beta.reshape(1, h))
    if rows_p != rows:
        s, ln = s[:rows], ln[:rows]
    return s, ln


# ------------------- Linear (matmul + bias [+ GELU] [+ residual]) ------------

def _linear_kernel(x_ref, w_ref, b_ref, *rest, activation, has_residual):
    if has_residual:
        r_ref, o_ref = rest
    else:
        (o_ref,) = rest
    acc = jnp.dot(x_ref[...], w_ref[...], preferred_element_type=jnp.float32)
    acc = acc + b_ref[...].astype(jnp.float32)
    if activation == "gelu":
        acc = _gelu(acc)
    if has_residual:
        acc = acc + r_ref[...].astype(jnp.float32)
    o_ref[...] = acc.astype(o_ref.dtype)


def linear(x, w, b, *, activation=None, residual=None):
    """x:[R,K] @ w:[K,N] + b, then optional GELU, then optional + residual."""
    rows, k = x.shape
    n = w.shape[1]
    tm = _pick_row_tile(rows)
    tn = _pick_col_tile(n)
    rows_p = _round_up(rows, tm)
    xp = _pad_rows(x, rows_p)
    in_specs = [
        pl.BlockSpec((tm, k), lambda i, j: (i, 0)),
        pl.BlockSpec((k, tn), lambda i, j: (0, j)),
        pl.BlockSpec((1, tn), lambda i, j: (0, j)),
    ]
    args = [xp, w, b.reshape(1, n)]
    if residual is not None:
        in_specs.append(pl.BlockSpec((tm, tn), lambda i, j: (i, j)))
        args.append(_pad_rows(residual, rows_p))
    out = pl.pallas_call(
        functools.partial(_linear_kernel, activation=activation,
                          has_residual=residual is not None),
        out_shape=jax.ShapeDtypeStruct((rows_p, n), x.dtype),
        grid_spec=pltpu.PrefetchScalarGridSpec(
            num_scalar_prefetch=0,
            grid=(rows_p // tm, n // tn),
            in_specs=in_specs,
            out_specs=pl.BlockSpec((tm, tn), lambda i, j: (i, j)),
        ),
        compiler_params=pltpu.CompilerParams(
            dimension_semantics=("parallel", "parallel")),
    )(*args)
    return out if rows_p == rows else out[:rows]


# ----------------------- Multi-head self-attention kernel --------------------

def _attention_kernel(q_ref, k_ref, v_ref, o_ref, *, scale):
    q = q_ref[...].astype(jnp.float32)                        # (heads, S, dh)
    k = k_ref[...].astype(jnp.float32)
    v = v_ref[...].astype(jnp.float32)
    s = jnp.einsum("hqd,hkd->hqk", q, k,
                   preferred_element_type=jnp.float32) * scale
    s = s - jnp.max(s, axis=-1, keepdims=True)
    p = jnp.exp(s)
    p = p / jnp.sum(p, axis=-1, keepdims=True)
    ctx = jnp.einsum("hqk,hkd->hqd", p, v, preferred_element_type=jnp.float32)
    o_ref[...] = ctx.astype(o_ref.dtype)


def attention(q, k, v, *, scale):
    batch, nh, seq, dh = q.shape
    blk = pl.BlockSpec((None, nh, seq, dh), lambda b: (b, 0, 0, 0))
    return pl.pallas_call(
        functools.partial(_attention_kernel, scale=scale),
        out_shape=jax.ShapeDtypeStruct((batch, nh, seq, dh), q.dtype),
        grid_spec=pltpu.PrefetchScalarGridSpec(
            num_scalar_prefetch=0,
            grid=(batch,),
            in_specs=[blk, blk, blk],
            out_specs=blk,
        ),
        compiler_params=pltpu.CompilerParams(dimension_semantics=("parallel",)),
    )(q, k, v)


# ----------------------------- Encoder forward -------------------------------

def encoder_forward(hidden_states, params, *, num_heads):
    """hidden_states: [B, S, H]. Returns encoded [B, S, H] (vis=False path)."""
    B, S, H = hidden_states.shape
    dh = H // num_heads
    scale = 1.0 / math.sqrt(dh)
    x2d = hidden_states.reshape(B * S, H)
    for lp in params["layers"]:
        # --- multi-head self-attention block ---
        ln1 = layernorm(x2d, lp["ln1_g"], lp["ln1_b"])
        w_qkv = jnp.concatenate(
            [lp["wq"].T, lp["wk"].T, lp["wv"].T], axis=1)     # [H, 3H]
        b_qkv = jnp.concatenate([lp["bq"], lp["bk"], lp["bv"]])  # [3H]
        qkv = linear(ln1, w_qkv, b_qkv)                        # [B*S, 3H]
        qkv = qkv.reshape(B, S, 3, num_heads, dh).transpose(2, 0, 3, 1, 4)
        ctx = attention(qkv[0], qkv[1], qkv[2], scale=scale)   # [B, h, S, dh]
        ctx2d = ctx.transpose(0, 2, 1, 3).reshape(B * S, H)
        # NOTE: self.out(context_layer) is computed-but-discarded in the
        # PyTorch forward (attention_output = context_layer) -> skipped here.
        # Residual add fused with ffn_norm; keep the sum for the MLP residual.
        x2d, ln2 = add_layernorm(ctx2d, x2d, lp["ln2_g"], lp["ln2_b"])
        # --- MLP block ---
        h1 = linear(ln2, lp["w1"].T, lp["b1"], activation="gelu")
        x2d = linear(h1, lp["w2"].T, lp["b2"], residual=x2d)
    out = layernorm(x2d, params["enc_g"], params["enc_b"])
    return out.reshape(B, S, H)


# ------------------------- pure-JAX reference --------------------------------

_HI = jax.lax.Precision.HIGHEST


def reference_forward(hidden_states, params, *, num_heads, eps=1e-6):
    B, S, H = hidden_states.shape
    dh = H // num_heads

    def ln(y, g, b):
        mu = jnp.mean(y, axis=-1, keepdims=True)
        var = jnp.mean((y - mu) ** 2, axis=-1, keepdims=True)
        return (y - mu) / jnp.sqrt(var + eps) * g + b

    def split_heads(t):
        return t.reshape(B, S, num_heads, dh).transpose(0, 2, 1, 3)

    h = hidden_states
    for lp in params["layers"]:
        res = h
        y = ln(h, lp["ln1_g"], lp["ln1_b"])
        q = split_heads(jnp.matmul(y, lp["wq"].T, precision=_HI) + lp["bq"])
        k = split_heads(jnp.matmul(y, lp["wk"].T, precision=_HI) + lp["bk"])
        v = split_heads(jnp.matmul(y, lp["wv"].T, precision=_HI) + lp["bv"])
        scores = jnp.einsum("bhqd,bhkd->bhqk", q, k, precision=_HI) / math.sqrt(dh)
        probs = jax.nn.softmax(scores, axis=-1)
        ctx = jnp.einsum("bhqk,bhkd->bhqd", probs, v, precision=_HI)
        ctx = ctx.transpose(0, 2, 1, 3).reshape(B, S, H)
        # self.out(ctx) is computed-and-discarded in the PyTorch forward.
        h = ctx + res
        res = h
        y = ln(h, lp["ln2_g"], lp["ln2_b"])
        y = _gelu(jnp.matmul(y, lp["w1"].T, precision=_HI) + lp["b1"])
        y = jnp.matmul(y, lp["w2"].T, precision=_HI) + lp["b2"]
        h = y + res
    return ln(h, params["enc_g"], params["enc_b"])


# ----------------------------------- test ------------------------------------

if __name__ == "__main__":
    B, S, H = 2, 8, 32
    num_heads, mlp_dim, num_layers = 4, 64, 2

    key = jax.random.PRNGKey(0)
    keys = iter(jax.random.split(key, 128))

    def nrm(shape, scl):
        return jax.random.normal(next(keys), shape, dtype=jnp.float32) * scl

    layers = []
    for _ in range(num_layers):
        layers.append(dict(
            ln1_g=1.0 + nrm((H,), 0.05), ln1_b=nrm((H,), 0.05),
            wq=nrm((H, H), 0.1), bq=nrm((H,), 0.02),
            wk=nrm((H, H), 0.1), bk=nrm((H,), 0.02),
            wv=nrm((H, H), 0.1), bv=nrm((H,), 0.02),
            ln2_g=1.0 + nrm((H,), 0.05), ln2_b=nrm((H,), 0.05),
            w1=nrm((mlp_dim, H), 0.1), b1=nrm((mlp_dim,), 0.02),
            w2=nrm((H, mlp_dim), 0.1), b2=nrm((H,), 0.02),
        ))
    params = dict(layers=layers,
                  enc_g=1.0 + nrm((H,), 0.05), enc_b=nrm((H,), 0.05))
    hidden_states = nrm((B, S, H), 1.0)

    out = encoder_forward(hidden_states, params, num_heads=num_heads)
    out = jax.block_until_ready(out)

    ref = reference_forward(hidden_states, params, num_heads=num_heads)
    assert out.shape == (B, S, H)
    # Tolerance covers MXU-pass vs XLA f32 matmul rounding differences; any
    # semantic error (wrong residual/LN/softmax/head-split) is O(0.1-1).
    assert jnp.allclose(out, ref, atol=1e-2, rtol=1e-2), "mismatch vs reference"

    print("KERNEL_OK")
</pallas_src>

<mosaic_0001>
module attributes {stable_mosaic.version = 11 : i64} {
  func.func @_layernorm_kernel(%arg0: i32, %arg1: memref<16x32xf32, #tpu.memory_space<vmem>>, %arg2: memref<1x32xf32, #tpu.memory_space<vmem>>, %arg3: memref<1x32xf32, #tpu.memory_space<vmem>>, %arg4: memref<16x32xf32, #tpu.memory_space<vmem>>) attributes {dimension_semantics = [#tpu.dimension_semantics<parallel>], iteration_bounds = array<i64: 1>, scalar_prefetch = 0 : i64, scratch_operands = 0 : i64, tpu.core_type = #tpu.core_type<tc>, window_params = [{transform_indices = @transform_0, window_bounds = array<i64: 16, 32>}, {pipeline_mode = #tpu.pipeline_mode<synchronous>, transform_indices = @transform_1, window_bounds = array<i64: 1, 32>}, {pipeline_mode = #tpu.pipeline_mode<synchronous>, transform_indices = @transform_2, window_bounds = array<i64: 1, 32>}, {transform_indices = @transform_3, window_bounds = array<i64: 16, 32>}]} {
    %c0 = arith.constant 0 : index
    %c0_0 = arith.constant 0 : index
    %0 = vector.load %arg1[%c0, %c0_0] : memref<16x32xf32, #tpu.memory_space<vmem>>, vector<16x32xf32>
    %cst = arith.constant dense<0.000000e+00> : vector<16xf32>
    %1 = vector.multi_reduction <add>, %0, %cst [1] : vector<16x32xf32> to vector<16xf32>
    %2 = vector.shape_cast %1 : vector<16xf32> to vector<16x1xf32>
    %cst_1 = arith.constant 3.200000e+01 : f32
    %3 = vector.broadcast %cst_1 : f32 to vector<16x1xf32>
    %4 = arith.divf %2, %3 : vector<16x1xf32>
    %5 = vector.broadcast %4 : vector<16x1xf32> to vector<16x32xf32>
    %6 = arith.subf %0, %5 : vector<16x32xf32>
    %7 = arith.mulf %6, %6 : vector<16x32xf32>
    %cst_2 = arith.constant dense<0.000000e+00> : vector<16xf32>
    %8 = vector.multi_reduction <add>, %7, %cst_2 [1] : vector<16x32xf32> to vector<16xf32>
    %9 = vector.shape_cast %8 : vector<16xf32> to vector<16x1xf32>
    %cst_3 = arith.constant 3.200000e+01 : f32
    %10 = vector.broadcast %cst_3 : f32 to vector<16x1xf32>
    %11 = arith.divf %9, %10 : vector<16x1xf32>
    %cst_4 = arith.constant 9.99999997E-7 : f32
    %12 = vector.broadcast %cst_4 : f32 to vector<16x1xf32>
    %13 = arith.addf %11, %12 : vector<16x1xf32>
    %14 = math.rsqrt %13 : vector<16x1xf32>
    %15 = vector.broadcast %14 : vector<16x1xf32> to vector<16x32xf32>
    %16 = arith.mulf %6, %15 : vector<16x32xf32>
    %c0_5 = arith.constant 0 : index
    %c0_6 = arith.constant 0 : index
    %17 = vector.load %arg2[%c0_5, %c0_6] : memref<1x32xf32, #tpu.memory_space<vmem>>, vector<1x32xf32>
    %18 = vector.broadcast %17 : vector<1x32xf32> to vector<16x32xf32>
    %19 = arith.mulf %16, %18 : vector<16x32xf32>
    %c0_7 = arith.constant 0 : index
    %c0_8 = arith.constant 0 : index
    %20 = vector.load %arg3[%c0_7, %c0_8] : memref<1x32xf32, #tpu.memory_space<vmem>>, vector<1x32xf32>
    %21 = vector.broadcast %20 : vector<1x32xf32> to vector<16x32xf32>
    %22 = arith.addf %19, %21 : vector<16x32xf32>
    %c0_9 = arith.constant 0 : index
    %c0_10 = arith.constant 0 : index
    %23 = vector.load %arg4[%c0_9, %c0_10] : memref<16x32xf32, #tpu.memory_space<vmem>>, vector<16x32xf32>
    tpu.vector_store %arg4[%c0_9, %c0_10], %22 {strides = array<i32>} : memref<16x32xf32, #tpu.memory_space<vmem>>, vector<16x32xf32>,
    return
  }
  func.func @transform_0(%arg0: i32) -> (i32, i32) {
    %c0_i32 = arith.constant 0 : i32
    %c0_i32_0 = arith.constant 0 : i32
    return %arg0, %c0_i32 : i32, i32
  }
  func.func @transform_1(%arg0: i32) -> (i32, i32) {
    %c0_i32 = arith.constant 0 : i32
    %c0_i32_0 = arith.constant 0 : i32
    %c0_i32_1 = arith.constant 0 : i32
    return %c0_i32, %c0_i32_0 : i32, i32
  }
  func.func @transform_2(%arg0: i32) -> (i32, i32) {
    %c0_i32 = arith.constant 0 : i32
    %c0_i32_0 = arith.constant 0 : i32
    %c0_i32_1 = arith.constant 0 : i32
    return %c0_i32, %c0_i32_0 : i32, i32
  }
  func.func @transform_3(%arg0: i32) -> (i32, i32) {
    %c0_i32 = arith.constant 0 : i32
    %c0_i32_0 = arith.constant 0 : i32
    return %arg0, %c0_i32 : i32, i32
  }
}

</mosaic_0001>

<bundles_post_ra>
// kernel: tpu_custom_call.1
= control target key start
LH: loop header
LB: loop body
LE: loop exit
PB: predicated region body
PF: predicated region fallthrough
CT: control target
= control target key end

     0   :  { %8 = vsyncpa [#allocation3], 0  ;;  %s220_s0 = inlined_call_operand.hbm [shape: f32[16,32], index: 0, kind: input, shape index: {}]   ;;  %s221_s1 = inlined_call_operand.vmem [shape: f32[1,32], index: 1, kind: input, shape index: {}]   ;;  %s222_s2 = inlined_call_operand.vmem [shape: f32[1,32], index: 2, kind: input, shape index: {}]   ;;  %s223_s3 = inlined_call_operand.hbm [shape: f32[16,32], index: 3, kind: output, shape index: {}]  }
   0x1   :  { %9 = vsyncpa [#allocation4], 0  ;;  %s154_s12 = smov [#allocation2]   ;;  %s106_s16 = scalar_lea.hbm %s220_s0, 256 }
   0x2   :  { %s15_s13 = sshll.u32 %s154_s12, 4  ;;  %p107_p0 = scmp.ne.s32.totalorder %s220_s0, %s106_s16  ;;  %s16_s13 = int_to_ptr.vmem [resolvable:$true] %s15_s13 }
   0x3   :  { %p110_p1 = scmp.lt.u32.totalorder %s106_s16, %s220_s0 }
   0x5   :  { %p112_p2 = pnand %p110_p1, %p107_p0 }
   0x7   :  { %115 = shalt.err (!%p112_p2)
}
   0x8   :  { %s116_s21 = scalar_lea.vmem %s16_s13, 256  ;;  %p121_p4 = scmp.lt.s32.totalorder %s16_s13, %s16_s13 }
   0x9   :  { %p117_p3 = scmp.ne.s32.totalorder %s16_s13, %s116_s21  ;;  %p122_p5 = scmp.lt.s32.totalorder %s116_s21, %s116_s21 }
   0xb   :  { %p123_p6 = por %p122_p5, %p121_p4 }
   0xd   :  { %p124_p7 = pnand %p123_p6, %p117_p3 }
   0xf   :  { %127 = shalt.err (!%p124_p7)
}
  0x10   :  { %s155_s22 = smov 128   ;;  %s156_s23 = smov 8  }
  0x11   :  { %21 = dma.hbm_to_vmem [thread:$0]  %s220_s0, 256, %s16_s13, [#allocation3], %s155_s22, %s155_s22, %s156_s23  }
  0x12   :  { %150 = dma.done.wait [#allocation3], 256  }
  0x13   :  { %151 = vsyncadd [#allocation3], 4294967040  ;;  %vm31_vm0 = vcmask 261120   ;;  %v29_v0 = vld [vmem:[#allocation2] sm:$0xff]  ;;  %v30_v1 = vld [vmem:[#allocation2 + $0x8] sm:$0xff]  ;;  %s157_s29 = smov [#allocation5]  }
  0x14   :  { %v32_v2 = vsel %vm31_vm0, %v29_v0, 0.0  ;;  %v35_v3 = vsel %vm31_vm0, %v30_v1, 0.0  ;;  %v96_v21 = vld [vmem:[%s221_s1] ss:$0 sm:$0xff]  ;;  %s84_s30 = sshll.u32 %s157_s29, 4  ;;  %s85_s30 = int_to_ptr.vmem [resolvable:$true] %s84_s30 }
  0x15   :  { %33 = vadd.xlane.f32.xlu0 %v32_v2  ;;  %v97_v23 = vld [vmem:[%s222_s2] ss:$0 sm:$0xff]  ;;  %s128_s4 = scalar_lea.vmem %s85_s30, 256  ;;  %p133_p9 = scmp.lt.s32.totalorder %s85_s30, %s85_s30 }
  0x16   :  { %p129_p8 = scmp.ne.s32.totalorder %s85_s30, %s128_s4  ;;  %p134_p10 = scmp.lt.s32.totalorder %s128_s4, %s128_s4 }
  0x18   :  { %p135_p11 = por %p134_p10, %p133_p9 }
  0x19   :  { %36 = vadd.xlane.f32.xlu0 %v35_v3 }
  0x1a   :  { %p136_p12 = pnand %p135_p11, %p129_p8 }
  0xa2   :  { %v34_v4 = vpop.xlane.xlu0 %33 }
  0xa3   :  { %v39_v5 = vmul.f32 0.03125, %v34_v4 }
  0xa5   :  { %v41_v6 = vsub.f32 %v29_v0, %v39_v5 }
  0xa6   :  { %v37_v7 = vpop.xlane.xlu0 %36 }
  0xa7   :  { %v40_v8 = vmul.f32 0.03125, %v37_v7  ;;  %v43_v9 = vmul.f32 %v41_v6, %v41_v6 }
  0xa9   :  { %v42_v10 = vsub.f32 %v30_v1, %v40_v8  ;;  %v45_v11 = vsel %vm31_vm0, %v43_v9, 0.0 }
  0xaa   :  { %46 = vadd.xlane.f32.xlu1 %v45_v11 }
  0xab   :  { %v44_v12 = vmul.f32 %v42_v10, %v42_v10 }
  0xad   :  { %v48_v13 = vsel %vm31_vm0, %v44_v12, 0.0 }
  0xae   :  { %49 = vadd.xlane.f32.xlu1 %v48_v13 }
 0x137   :  { %v47_v14 = vpop.xlane.xlu1 %46 }
 0x138   :  { %v51_v15 = vmul.f32 0.03125, %v47_v14 }
 0x13a   :  { %v53_v16 = vadd.f32 1e-06, %v51_v15 }
 0x13b   :  { %v50_v17 = vpop.xlane.xlu1 %49 }
 0x13c   :  { %102 = vrsqrt.f32 %v53_v16  ;;  %v52_v18 = vmul.f32 0.03125, %v50_v17 }
 0x13e   :  { %v54_v19 = vadd.f32 1e-06, %v52_v18 }
 0x140   :  { %104 = vrsqrt.f32 %v54_v19 }
 0x146   :  { %v103_v20 = vpop.eup %102 }
 0x147   :  { %v57_v22 = vmul.f32 %v103_v20, %v41_v6 }
 0x149   :  { %v66_v24 = vmul.f32 %v96_v21, %v57_v22 }
 0x14a   :  { %v105_v25 = vpop.eup %104 }
 0x14b   :  { %v58_v26 = vmul.f32 %v105_v25, %v42_v10  ;;  %v75_v27 = vadd.f32 %v97_v23, %v66_v24 }
 0x14d   :  { %v67_v28 = vmul.f32 %v96_v21, %v58_v26  ;;  %77 = vst.msk [vmem:[#allocation5] sm:$0xff] %vm31_vm0, %v75_v27 }
 0x14f   :  { %v76_v29 = vadd.f32 %v97_v23, %v67_v28 }
 0x151   :  { %78 = vst.msk [vmem:[#allocation5 + $0x8] sm:$0xff] %vm31_vm0, %v76_v29 }
 0x152   :  { %139 = shalt.err (!%p136_p12)
}
 0x153   :  { %s140_s5 = scalar_lea.hbm %s223_s3, 256 }
 0x154   :  { %p141_p13 = scmp.ne.s32.totalorder %s223_s3, %s140_s5  ;;  %p144_p0 = scmp.lt.u32.totalorder %s140_s5, %s223_s3 }
 0x156   :  { %p146_p1 = pnand %p144_p0, %p141_p13 }
 0x158   :  { %149 = shalt.err (!%p146_p1)
}
 0x159   :  { %90 = dma.vmem_to_hbm [thread:$0]  %s85_s30, 256, %s223_s3, [#allocation4], %s155_s22, %s155_s22, %s156_s23  }
 0x15a   :  { %152 = dma.done.wait [#allocation4], 256  }
 0x15b   :  { %153 = vsyncadd [#allocation4], 4294967040 }
 0x15c   :  { %94 = vsyncpa [#allocation3], 1 }
 0x15d   :  { %95 = vsyncpa [#allocation4], 1 }

</bundles_post_ra>
